<compile_context>
chip_gen: v7x
topology: tpu7x:2x2x1
jax: 0.10.0
libtpu: 0.0.40
codegen_flags: <defaults>
</compile_context>

<pallas_src>
import functools

import jax
import jax.numpy as jnp
from jax.experimental import pallas as pl
from jax.experimental.pallas import tpu as pltpu


def _critic_kernel(x_ref, w1_ref, b1_ref, w2_ref, b2_ref, w3_ref, b3_ref, o_ref):
    # x: [TB, D_in] f32 -> bf16 for the MXU; accumulate in f32.
    x = x_ref[...].astype(jnp.bfloat16)

    h1 = jnp.dot(x, w1_ref[...], preferred_element_type=jnp.float32) + b1_ref[...]
    h1 = jnp.maximum(h1, 0.0)  # ReLU

    h2 = jnp.dot(h1.astype(jnp.bfloat16), w2_ref[...],
                 preferred_element_type=jnp.float32) + b2_ref[...]
    h2 = jnp.maximum(h2, 0.0)  # ReLU

    # Final layer has out_features == 1: an MXU matmul would use a single
    # result column, so do it on the VPU (broadcast multiply) + XLU lane
    # reduction instead — both units are otherwise idle here.
    w3 = w3_ref[...].astype(jnp.float32)                       # [1, F2]
    v = jnp.sum(h2 * w3, axis=-1, keepdims=True) + b3_ref[...]  # [TB, 1]
    o_ref[...] = v.astype(o_ref.dtype)


def _round_up(x, m):
    return (x + m - 1) // m * m


@functools.partial(jax.jit, static_argnames=("tile_b",))
def critic_forward(state, w1, b1, w2, b2, w3, b3, *, tile_b=256):
    """state: [B, input_dims] f32 -> value: [B, 1] f32."""
    B, d_in = state.shape

    # Batch tile: at most `tile_b`, at least 8 (sublane alignment); pad the
    # batch so the grid divides evenly, then slice the result back.
    tb = min(tile_b, _round_up(B, 8))
    b_pad = _round_up(B, tb)
    if b_pad != B:
        state = jnp.pad(state, ((0, b_pad - B), (0, 0)))

    resident = lambda shape: pl.BlockSpec(shape, lambda i: (0, 0))

    out = pl.pallas_call(
        _critic_kernel,
        out_shape=jax.ShapeDtypeStruct((b_pad, 1), jnp.float32),
        grid=(b_pad // tb,),
        in_specs=[
            pl.BlockSpec((tb, d_in), lambda i: (i, 0)),   # activations: tiled over B
            resident(w1.shape), resident(b1.shape),       # params: resident in VMEM
            resident(w2.shape), resident(b2.shape),
            resident(w3.shape), resident(b3.shape),
        ],
        out_specs=pl.BlockSpec((tb, 1), lambda i: (i, 0)),
        compiler_params=pltpu.CompilerParams(
            dimension_semantics=("parallel",)),
    )(state, w1, b1, w2, b2, w3, b3)
    return out[:B]


def init_params(key, input_dims, fc1_dims=256, fc2_dims=256):
    """PyTorch-Linear-style init: U(-1/sqrt(fan_in), 1/sqrt(fan_in)).
    Weights are stored [in, out] in bf16; biases stay f32."""
    ks = jax.random.split(key, 6)

    def linear(kw, kb, fan_in, fan_out):
        bound = 1.0 / jnp.sqrt(float(fan_in))
        w = jax.random.uniform(kw, (fan_in, fan_out), jnp.float32, -bound, bound)
        b = jax.random.uniform(kb, (1, fan_out), jnp.float32, -bound, bound)
        return w.astype(jnp.bfloat16), b

    w1, b1 = linear(ks[0], ks[1], input_dims, fc1_dims)
    w2, b2 = linear(ks[2], ks[3], fc1_dims, fc2_dims)
    w3_col, b3 = linear(ks[4], ks[5], fc2_dims, 1)
    w3 = w3_col.reshape(1, fc2_dims)     # store the [fc2, 1] column as a row
    return w1, b1, w2, b2, w3, b3


if __name__ == "__main__":
    key = jax.random.PRNGKey(0)
    k_params, k_state = jax.random.split(key)

    batch = 8
    input_dims = 32   # small observation vector, e.g. racing state features
    fc1_dims = 256
    fc2_dims = 256

    w1, b1, w2, b2, w3, b3 = init_params(k_params, input_dims, fc1_dims, fc2_dims)
    state = jax.random.normal(k_state, (batch, input_dims), jnp.float32)

    value = critic_forward(state, w1, b1, w2, b2, w3, b3)
    jax.block_until_ready(value)

    # Pure-JAX reference mirroring the kernel's bf16 MXU inputs / f32 accumulation.
    xb = state.astype(jnp.bfloat16).astype(jnp.float32)
    w1f = w1.astype(jnp.float32)
    w2f = w2.astype(jnp.float32)
    w3f = w3.astype(jnp.float32)
    h1 = jnp.maximum(xb @ w1f + b1, 0.0)
    h2 = jnp.maximum(h1.astype(jnp.bfloat16).astype(jnp.float32) @ w2f + b2, 0.0)
    ref = jnp.sum(h2 * w3f, axis=-1, keepdims=True) + b3

    assert value.shape == (batch, 1)
    assert jnp.allclose(value, ref, atol=1e-3, rtol=1e-3)

    print("KERNEL_OK")
</pallas_src>

<mosaic_0001>
module attributes {stable_mosaic.version = 11 : i64} {
  func.func @_critic_kernel(%arg0: i32, %arg1: memref<8x32xf32, #tpu.memory_space<vmem>>, %arg2: memref<32x256xbf16, #tpu.memory_space<vmem>>, %arg3: memref<1x256xf32, #tpu.memory_space<vmem>>, %arg4: memref<256x256xbf16, #tpu.memory_space<vmem>>, %arg5: memref<1x256xf32, #tpu.memory_space<vmem>>, %arg6: memref<1x256xbf16, #tpu.memory_space<vmem>>, %arg7: memref<1x1xf32, #tpu.memory_space<vmem>>, %arg8: memref<8x1xf32, #tpu.memory_space<vmem>>) attributes {dimension_semantics = [#tpu.dimension_semantics<parallel>], iteration_bounds = array<i64: 1>, scalar_prefetch = 0 : i64, scratch_operands = 0 : i64, tpu.core_type = #tpu.core_type<tc>, window_params = [{transform_indices = @transform_0, window_bounds = array<i64: 8, 32>}, {pipeline_mode = #tpu.pipeline_mode<synchronous>, transform_indices = @transform_1, window_bounds = array<i64: 32, 256>}, {pipeline_mode = #tpu.pipeline_mode<synchronous>, transform_indices = @transform_2, window_bounds = array<i64: 1, 256>}, {pipeline_mode = #tpu.pipeline_mode<synchronous>, transform_indices = @transform_3, window_bounds = array<i64: 256, 256>}, {pipeline_mode = #tpu.pipeline_mode<synchronous>, transform_indices = @transform_4, window_bounds = array<i64: 1, 256>}, {pipeline_mode = #tpu.pipeline_mode<synchronous>, transform_indices = @transform_5, window_bounds = array<i64: 1, 256>}, {pipeline_mode = #tpu.pipeline_mode<synchronous>, transform_indices = @transform_6, window_bounds = array<i64: 1, 1>}, {transform_indices = @transform_7, window_bounds = array<i64: 8, 1>}]} {
    %c0 = arith.constant 0 : index
    %c0_0 = arith.constant 0 : index
    %0 = vector.load %arg1[%c0, %c0_0] : memref<8x32xf32, #tpu.memory_space<vmem>>, vector<8x32xf32>
    %1 = arith.truncf %0 : vector<8x32xf32> to vector<8x32xbf16>
    %c0_1 = arith.constant 0 : index
    %c0_2 = arith.constant 0 : index
    %2 = vector.load %arg2[%c0_1, %c0_2] : memref<32x256xbf16, #tpu.memory_space<vmem>>, vector<32x256xbf16>
    %cst = arith.constant dense<0.000000e+00> : vector<8x256xf32>
    %3 = tpu.matmul %1, %2, %cst {dimension_numbers = #tpu.dot_dimension_numbers<[1], [0], [0], [1], [0, 0, 1, 1], [], []>} : vector<8x32xbf16>, vector<32x256xbf16>, vector<8x256xf32> -> vector<8x256xf32>
    %c0_3 = arith.constant 0 : index
    %c0_4 = arith.constant 0 : index
    %4 = vector.load %arg3[%c0_3, %c0_4] : memref<1x256xf32, #tpu.memory_space<vmem>>, vector<1x256xf32>
    %5 = vector.broadcast %4 : vector<1x256xf32> to vector<8x256xf32>
    %6 = arith.addf %3, %5 : vector<8x256xf32>
    %cst_5 = arith.constant 0.000000e+00 : f32
    %7 = vector.broadcast %cst_5 : f32 to vector<8x256xf32>
    %8 = arith.maximumf %6, %7 : vector<8x256xf32>
    %9 = arith.truncf %8 : vector<8x256xf32> to vector<8x256xbf16>
    %c0_6 = arith.constant 0 : index
    %c0_7 = arith.constant 0 : index
    %10 = vector.load %arg4[%c0_6, %c0_7] : memref<256x256xbf16, #tpu.memory_space<vmem>>, vector<256x256xbf16>
    %cst_8 = arith.constant dense<0.000000e+00> : vector<8x256xf32>
    %11 = tpu.matmul %9, %10, %cst_8 {dimension_numbers = #tpu.dot_dimension_numbers<[1], [0], [0], [1], [0, 0, 1, 1], [], []>} : vector<8x256xbf16>, vector<256x256xbf16>, vector<8x256xf32> -> vector<8x256xf32>
    %c0_9 = arith.constant 0 : index
    %c0_10 = arith.constant 0 : index
    %12 = vector.load %arg5[%c0_9, %c0_10] : memref<1x256xf32, #tpu.memory_space<vmem>>, vector<1x256xf32>
    %13 = vector.broadcast %12 : vector<1x256xf32> to vector<8x256xf32>
    %14 = arith.addf %11, %13 : vector<8x256xf32>
    %cst_11 = arith.constant 0.000000e+00 : f32
    %15 = vector.broadcast %cst_11 : f32 to vector<8x256xf32>
    %16 = arith.maximumf %14, %15 : vector<8x256xf32>
    %c0_12 = arith.constant 0 : index
    %c0_13 = arith.constant 0 : index
    %17 = vector.load %arg6[%c0_12, %c0_13] : memref<1x256xbf16, #tpu.memory_space<vmem>>, vector<1x256xbf16>
    %18 = arith.extf %17 : vector<1x256xbf16> to vector<1x256xf32>
    %19 = vector.broadcast %18 : vector<1x256xf32> to vector<8x256xf32>
    %20 = arith.mulf %16, %19 : vector<8x256xf32>
    %cst_14 = arith.constant dense<0.000000e+00> : vector<8xf32>
    %21 = vector.multi_reduction <add>, %20, %cst_14 [1] : vector<8x256xf32> to vector<8xf32>
    %22 = vector.shape_cast %21 : vector<8xf32> to vector<8x1xf32>
    %c0_15 = arith.constant 0 : index
    %c0_16 = arith.constant 0 : index
    %23 = vector.load %arg7[%c0_15, %c0_16] : memref<1x1xf32, #tpu.memory_space<vmem>>, vector<1x1xf32>
    %24 = vector.broadcast %23 : vector<1x1xf32> to vector<8x1xf32>
    %25 = arith.addf %22, %24 : vector<8x1xf32>
    %c0_17 = arith.constant 0 : index
    %c0_18 = arith.constant 0 : index
    %26 = vector.load %arg8[%c0_17, %c0_18] : memref<8x1xf32, #tpu.memory_space<vmem>>, vector<8x1xf32>
    tpu.vector_store %arg8[%c0_17, %c0_18], %25 {strides = array<i32>} : memref<8x1xf32, #tpu.memory_space<vmem>>, vector<8x1xf32>,
    return
  }
  func.func @transform_0(%arg0: i32) -> (i32, i32) {
    %c0_i32 = arith.constant 0 : i32
    %c0_i32_0 = arith.constant 0 : i32
    return %arg0, %c0_i32 : i32, i32
  }
  func.func @transform_1(%arg0: i32) -> (i32, i32) {
    %c0_i32 = arith.constant 0 : i32
    %c0_i32_0 = arith.constant 0 : i32
    %c0_i32_1 = arith.constant 0 : i32
    return %c0_i32, %c0_i32_0 : i32, i32
  }
  func.func @transform_2(%arg0: i32) -> (i32, i32) {
    %c0_i32 = arith.constant 0 : i32
    %c0_i32_0 = arith.constant 0 : i32
    %c0_i32_1 = arith.constant 0 : i32
    return %c0_i32, %c0_i32_0 : i32, i32
  }
  func.func @transform_3(%arg0: i32) -> (i32, i32) {
    %c0_i32 = arith.constant 0 : i32
    %c0_i32_0 = arith.constant 0 : i32
    %c0_i32_1 = arith.constant 0 : i32
    return %c0_i32, %c0_i32_0 : i32, i32
  }
  func.func @transform_4(%arg0: i32) -> (i32, i32) {
    %c0_i32 = arith.constant 0 : i32
    %c0_i32_0 = arith.constant 0 : i32
    %c0_i32_1 = arith.constant 0 : i32
    return %c0_i32, %c0_i32_0 : i32, i32
  }
  func.func @transform_5(%arg0: i32) -> (i32, i32) {
    %c0_i32 = arith.constant 0 : i32
    %c0_i32_0 = arith.constant 0 : i32
    %c0_i32_1 = arith.constant 0 : i32
    return %c0_i32, %c0_i32_0 : i32, i32
  }
  func.func @transform_6(%arg0: i32) -> (i32, i32) {
    %c0_i32 = arith.constant 0 : i32
    %c0_i32_0 = arith.constant 0 : i32
    %c0_i32_1 = arith.constant 0 : i32
    return %c0_i32, %c0_i32_0 : i32, i32
  }
  func.func @transform_7(%arg0: i32) -> (i32, i32) {
    %c0_i32 = arith.constant 0 : i32
    %c0_i32_0 = arith.constant 0 : i32
    return %arg0, %c0_i32 : i32, i32
  }
}

</mosaic_0001>

<bundles_post_ra>
// kernel: critic_forward.1
= control target key start
LH: loop header
LB: loop body
LE: loop exit
PB: predicated region body
PF: predicated region fallthrough
CT: control target
= control target key end

     0   :  { %s715_s0 = inlined_call_operand.hbm [shape: f32[8,32], index: 0, kind: input, shape index: {}]   ;;  %s716_s1 = inlined_call_operand.hbm [shape: bf16[32,256], index: 1, kind: input, shape index: {}]   ;;  %s717_s2 = inlined_call_operand.vmem [shape: f32[1,256], index: 2, kind: input, shape index: {}]   ;;  %s718_s3 = inlined_call_operand.hbm [shape: bf16[256,256], index: 3, kind: input, shape index: {}]   ;;  %s719_s4 = inlined_call_operand.vmem [shape: f32[1,256], index: 4, kind: input, shape index: {}]   ;;  %s720_s5 = inlined_call_operand.vmem [shape: bf16[1,256], index: 5, kind: input, shape index: {}]   ;;  %s721_s6 = inlined_call_operand.<no memory space> [shape: f32[1,1], index: 6, kind: input, shape index: {}]   ;;  %s722_s7 = inlined_call_operand.vmem [shape: f32[8,1], index: 7, kind: output, shape index: {}]  }
   0x1   :  { %v12_v0 = vstv %s721_s6 }
   0x2   :  { %13 = vst [vmem:[#allocation2] sm:$0x1] %v12_v0 }
   0x3   :  { %14 = vsyncpa [#allocation4], 0 }
   0x4   :  { %15 = vsyncpa [#allocation6], 0  ;;  %s612_s26 = smov [#allocation5]   ;;  %s542_s30 = scalar_lea.hbm %s716_s1, 512 }
   0x5   :  { %s31_s27 = sshll.u32 %s612_s26, 4  ;;  %p543_p0 = scmp.ne.s32.totalorder %s716_s1, %s542_s30  ;;  %s32_s27 = int_to_ptr.vmem [resolvable:$true] %s31_s27 }
   0x6   :  { %p546_p1 = scmp.lt.u32.totalorder %s542_s30, %s716_s1 }
   0x8   :  { %p548_p2 = pnand %p546_p1, %p543_p0 }
   0xa   :  { %551 = shalt.err (!%p548_p2)
}
   0xb   :  { %s552_s6 = scalar_lea.vmem %s32_s27, 512  ;;  %p557_p4 = scmp.lt.s32.totalorder %s32_s27, %s32_s27 }
   0xc   :  { %p553_p3 = scmp.ne.s32.totalorder %s32_s27, %s552_s6  ;;  %p558_p5 = scmp.lt.s32.totalorder %s552_s6, %s552_s6 }
   0xe   :  { %p559_p6 = por %p558_p5, %p557_p4 }
  0x10   :  { %p560_p7 = pnand %p559_p6, %p553_p3 }
  0x12   :  { %563 = shalt.err (!%p560_p7)
}
  0x13   :  { %s613_s12 = smov 128   ;;  %s614_s13 = smov 8  }
  0x14   :  { %37 = dma.hbm_to_vmem [thread:$0]  %s716_s1, 512, %s32_s27, [#allocation6], %s613_s12, %s613_s12, %s614_s13  }
  0x15   :  { %s615_s16 = smov [#allocation3]   ;;  %s616_s18 = smov [#allocation7]  }
  0x16   :  { %s22_s17 = sshll.u32 %s615_s16, 4  ;;  %s45_s19 = sshll.u32 %s616_s18, 4  ;;  %s23_s17 = int_to_ptr.vmem [resolvable:$true] %s22_s17  ;;  %s46_s19 = int_to_ptr.vmem [resolvable:$true] %s45_s19 }
  0x17   :  { %s564_s22 = scalar_lea.hbm %s715_s0, 128 }
  0x18   :  { %p565_p8 = scmp.ne.s32.totalorder %s715_s0, %s564_s22  ;;  %p568_p9 = scmp.lt.u32.totalorder %s564_s22, %s715_s0 }
  0x1a   :  { %p570_p10 = pnand %p568_p9, %p565_p8 }
  0x1c   :  { %573 = shalt.err (!%p570_p10)
}
  0x1d   :  { %s574_s1 = scalar_lea.vmem %s23_s17, 128  ;;  %p579_p12 = scmp.lt.s32.totalorder %s23_s17, %s23_s17 }
  0x1e   :  { %p575_p11 = scmp.ne.s32.totalorder %s23_s17, %s574_s1  ;;  %p580_p13 = scmp.lt.s32.totalorder %s574_s1, %s574_s1 }
  0x20   :  { %p581_p0 = por %p580_p13, %p579_p12 }
  0x22   :  { %p582_p1 = pnand %p581_p0, %p575_p11 }
  0x24   :  { %585 = shalt.err (!%p582_p1)
}
  0x25   :  { %25 = dma.hbm_to_vmem [thread:$0]  %s715_s0, 128, %s23_s17, [#allocation4]  }
  0x26   :  { %s586_s8 = scalar_lea.hbm %s718_s3, 4096 }
  0x27   :  { %p587_p2 = scmp.ne.s32.totalorder %s718_s3, %s586_s8  ;;  %p590_p3 = scmp.lt.u32.totalorder %s586_s8, %s718_s3 }
  0x29   :  { %p592_p4 = pnand %p590_p3, %p587_p2 }
  0x2b   :  { %595 = shalt.err (!%p592_p4)
}
  0x2c   :  { %s596_s14 = scalar_lea.vmem %s46_s19, 4096  ;;  %p601_p6 = scmp.lt.s32.totalorder %s46_s19, %s46_s19 }
  0x2d   :  { %p597_p5 = scmp.ne.s32.totalorder %s46_s19, %s596_s14  ;;  %p602_p7 = scmp.lt.s32.totalorder %s596_s14, %s596_s14 }
  0x2f   :  { %p603_p8 = por %p602_p7, %p601_p6 }
  0x31   :  { %p604_p9 = pnand %p603_p8, %p597_p5 }
  0x33   :  { %607 = shalt.err (!%p604_p9)
}
  0x34   :  { %51 = dma.hbm_to_vmem [thread:$0]  %s718_s3, 4096, %s46_s19, [#allocation6], %s613_s12, %s613_s12, %s614_s13  }
  0x35   :  { %608 = dma.done.wait [#allocation4], 128  }
  0x36   :  { %609 = vsyncadd [#allocation4], 4294967168 }
  0x37   :  { %610 = dma.done.wait [#allocation6], 4608  }
  0x38   :  { %611 = vsyncadd [#allocation6], 4294962688  ;;  %v617_v1 = vmov 0   ;;  %v488_v2 = vld [vmem:[#allocation5 + $0x4] ss:$8 sps:$4 sm:$0xff]   ;;  %v68_v6 = vld [vmem:[#allocation3] sm:$0xff]  ;;  %v76_v40 = vlaneseq }
  0x39   :  { %142 = vmatprep.mubr.bf16.mxu0 %v617_v1  ;;  %v490_v3 = vld [vmem:[#allocation5] ss:$8 sps:$4 sm:$0xff]   ;;  %110 = vmatprep.subr.bf16.mxu0 %v488_v2  ;;  %v491_v4 = vld [vmem:[#allocation5 + $0x14] ss:$8 sps:$4 sm:$0xff]   ;;  %v493_v5 = vld [vmem:[#allocation5 + $0x10] ss:$8 sps:$4 sm:$0xff]   ;;  %v69_v10 = vpack.c.bf16 %v68_v6, %v68_v6 }
  0x3a   :  { %111 = vmatpush1.bf16.msra.mxu0 %v490_v3  ;;  %v494_v7 = vld [vmem:[#allocation7 + $0x4] ss:$8 sps:$4 sm:$0xff]   ;;  %v496_v8 = vld [vmem:[#allocation7] ss:$8 sps:$4 sm:$0xff]   ;;  %v497_v9 = vld [vmem:[#allocation7 + $0x14] ss:$8 sps:$4 sm:$0xff]  }
  0x3b   :  { %112 = vmatprep.subr.bf16.mxu0 %v491_v4  ;;  %359 = vmatprep.subr.bf16.mxu1 %v494_v7  ;;  %v499_v11 = vld [vmem:[#allocation7 + $0x10] ss:$8 sps:$4 sm:$0xff]   ;;  %vm106_vm0 = vcmask 261120   ;;  %v500_v12 = vld [vmem:[#allocation7 + $0x24] ss:$8 sps:$4 sm:$0xff]   ;;  %v77_v41 = vshrl.u32 %v76_v40, 7 }
  0x3c   :  { %360 = vmatpush1.bf16.msra.mxu1 %v496_v8  ;;  %v502_v13 = vld [vmem:[#allocation7 + $0x20] ss:$8 sps:$4 sm:$0xff]   ;;  %v503_v14 = vld [vmem:[#allocation7 + $0x34] ss:$8 sps:$4 sm:$0xff]   ;;  %v505_v15 = vld [vmem:[#allocation7 + $0x30] ss:$8 sps:$4 sm:$0xff]  }
  0x3d   :  { %361 = vmatprep.subr.bf16.mxu1 %v497_v9  ;;  %v506_v16 = vld [vmem:[#allocation7 + $0x44] ss:$8 sps:$4 sm:$0xff]   ;;  %v508_v17 = vld [vmem:[#allocation7 + $0x40] ss:$8 sps:$4 sm:$0xff]   ;;  %v509_v18 = vld [vmem:[#allocation7 + $0x54] ss:$8 sps:$4 sm:$0xff]  }
  0x3e   :  { %113 = vmatpush1.bf16.msra.mxu0 %v493_v5  ;;  %v511_v19 = vld [vmem:[#allocation7 + $0x50] ss:$8 sps:$4 sm:$0xff]   ;;  %v512_v20 = vld [vmem:[#allocation7 + $0x64] ss:$8 sps:$4 sm:$0xff]   ;;  %v514_v21 = vld [vmem:[#allocation7 + $0x60] ss:$8 sps:$4 sm:$0xff]  }
  0x3f   :  { %v515_v22 = vld [vmem:[#allocation7 + $0x74] ss:$8 sps:$4 sm:$0xff]   ;;  %v517_v23 = vld [vmem:[#allocation7 + $0x70] ss:$8 sps:$4 sm:$0xff]   ;;  %v518_v24 = vld [vmem:[#allocation7 + $0x84] ss:$8 sps:$4 sm:$0xff]  }
  0x40   :  { %362 = vmatpush1.bf16.msra.mxu1 %v499_v11  ;;  %v520_v25 = vld [vmem:[#allocation7 + $0x80] ss:$8 sps:$4 sm:$0xff]   ;;  %v521_v26 = vld [vmem:[#allocation7 + $0x94] ss:$8 sps:$4 sm:$0xff]   ;;  %v523_v27 = vld [vmem:[#allocation7 + $0x90] ss:$8 sps:$4 sm:$0xff]  }
  0x41   :  { %448 = vmatmul.mubr.msk.bf16.vlgmr.msra.gmra.mrb[0].mxu0 %vm106_vm0, %v69_v10  ;;  %363 = vmatprep.subr.bf16.mxu1 %v500_v12  ;;  %v524_v28 = vld [vmem:[#allocation7 + $0xa4] ss:$8 sps:$4 sm:$0xff]   ;;  %v526_v29 = vld [vmem:[#allocation7 + $0xa0] ss:$8 sps:$4 sm:$0xff]   ;;  %v527_v30 = vld [vmem:[#allocation7 + $0xb4] ss:$8 sps:$4 sm:$0xff]  }
  0x42   :  { %v529_v31 = vld [vmem:[#allocation7 + $0xb0] ss:$8 sps:$4 sm:$0xff]   ;;  %v530_v32 = vld [vmem:[#allocation7 + $0xc4] ss:$8 sps:$4 sm:$0xff]   ;;  %v532_v33 = vld [vmem:[#allocation7 + $0xc0] ss:$8 sps:$4 sm:$0xff]  }
  0x43   :  { %v533_v34 = vld [vmem:[#allocation7 + $0xd4] ss:$8 sps:$4 sm:$0xff]   ;;  %v535_v35 = vld [vmem:[#allocation7 + $0xd0] ss:$8 sps:$4 sm:$0xff]   ;;  %v536_v36 = vld [vmem:[#allocation7 + $0xe4] ss:$8 sps:$4 sm:$0xff]  }
  0x44   :  { %364 = vmatpush1.bf16.msra.mxu1 %v502_v13  ;;  %v538_v37 = vld [vmem:[#allocation7 + $0xe0] ss:$8 sps:$4 sm:$0xff]   ;;  %v539_v38 = vld [vmem:[#allocation7 + $0xf4] ss:$8 sps:$4 sm:$0xff]   ;;  %v541_v39 = vld [vmem:[#allocation7 + $0xf0] ss:$8 sps:$4 sm:$0xff]  }
  0x45   :  { %365 = vmatprep.subr.bf16.mxu1 %v503_v14  ;;  %v78_v42 = vsub.s32 0, %v77_v41  ;;  %v74_v43 = vld [vmem:[%s717_s2] sm:$0x3]  ;;  %v82_v44 = vsub.s32 1, %v77_v41  ;;  %v411_v60 = vsub.s32 2, %v77_v41  ;;  %vm436_vm1 = vcmask 7168  }
  0x46   :  { %v402_v57 = vld [vmem:[%s720_s5] sm:$0x3] }
  0x47   :  { %v79_v45 = vrot.slane %v74_v43, %v78_v42  ;;  %v83_v46 = vrot.slane %v74_v43, %v82_v44  ;;  %v403_v58 = vunpack.c.l.bf16 %v402_v57  ;;  %v187_v59 = vld [vmem:[%s719_s4] sm:$0x3] }
  0x48   :  { %366 = vmatpush1.bf16.msra.mxu1 %v505_v15  ;;  %v192_v61 = vrot.slane %v187_v59, %v78_v42  ;;  %v196_v63 = vrot.slane %v187_v59, %v82_v44  ;;  %v481_v14 = vld [vmem:[#allocation2] ss:$0 sm:$0xff] }
  0x49   :  { %367 = vmatprep.subr.bf16.mxu1 %v506_v16  ;;  %v408_v62 = vrot.slane %v403_v58, %v78_v42  ;;  %v412_v0 = vrot.slane %v403_v58, %v411_v60 }
  0x4b   :  { %v418_v4 = vrot.slane %v408_v62, %v78_v42  ;;  %v422_v7 = vrot.slane %v412_v0, %v78_v42 }
  0x4c   :  { %368 = vmatpush1.bf16.msra.mxu1 %v508_v17 }
  0x4d   :  { %369 = vmatprep.subr.bf16.mxu1 %v509_v18 }
  0x50   :  { %370 = vmatpush1.bf16.msra.mxu1 %v511_v19 }
  0x51   :  { %371 = vmatprep.subr.bf16.mxu1 %v512_v20 }
  0x54   :  { %372 = vmatpush1.bf16.msra.mxu1 %v514_v21 }
  0x55   :  { %373 = vmatprep.subr.bf16.mxu1 %v515_v22 }
  0x58   :  { %374 = vmatpush1.bf16.msra.mxu1 %v517_v23 }
  0x59   :  { %375 = vmatprep.subr.bf16.mxu1 %v518_v24 }
  0x5c   :  { %376 = vmatpush1.bf16.msra.mxu1 %v520_v25 }
  0x5d   :  { %377 = vmatprep.subr.bf16.mxu1 %v521_v26 }
  0x60   :  { %378 = vmatpush1.bf16.msra.mxu1 %v523_v27 }
  0x61   :  { %379 = vmatprep.subr.bf16.mxu1 %v524_v28 }
  0x64   :  { %380 = vmatpush1.bf16.msra.mxu1 %v526_v29 }
  0x65   :  { %381 = vmatprep.subr.bf16.mxu1 %v527_v30 }
  0x68   :  { %382 = vmatpush1.bf16.msra.mxu1 %v529_v31 }
  0x69   :  { %383 = vmatprep.subr.bf16.mxu1 %v530_v32 }
  0x6c   :  { %384 = vmatpush1.bf16.msra.mxu1 %v532_v33 }
  0x6d   :  { %385 = vmatprep.subr.bf16.mxu1 %v533_v34 }
  0x70   :  { %386 = vmatpush1.bf16.msra.mxu1 %v535_v35 }
  0x71   :  { %387 = vmatprep.subr.bf16.mxu1 %v536_v36 }
  0x74   :  { %388 = vmatpush1.bf16.msra.mxu1 %v538_v37 }
  0x75   :  { %389 = vmatprep.subr.bf16.mxu1 %v539_v38 }
  0x78   :  { %390 = vmatpush1.bf16.msra.mxu1 %v541_v39 }
 0x114   :  { %v144_v47 = vpop.f32.mrb[0].mxu0 }
 0x115   :  { %v145_v48 = vadd.f32 %v144_v47, %v79_v45  ;;  %v146_v49 = vpop.f32.mrb[1].mxu0 }
 0x116   :  { %v147_v50 = vadd.f32 %v146_v49, %v83_v46  ;;  %v148_v51 = vpop.f32.mrb[2].mxu0 }
 0x117   :  { %v151_v52 = vmax.f32 %v145_v48, 0.0  ;;  %v149_v53 = vpop.f32.mrb[3].mxu0 }
 0x118   :  { %v152_v54 = vmax.f32 %v147_v50, 0.0 }
 0x119   :  { %v153_v56 = vpack.c.bf16 %v151_v52, %v151_v52 }
 0x11a   :  { %v154_v55 = vpack.c.bf16 %v152_v54, %v152_v54 }
 0x11c   :  { %391 = vmatprep.mubr.bf16.mxu1 %v154_v55 }
 0x11d   :  { %392 = vmatmul.mubr.bf16.vlgmr.msra.gmra.mrb[0].mxu1 %v153_v56 }
 0x1f0   :  { %v393_v1 = vpop.f32.mrb[0].mxu1 }
 0x1f1   :  { %v394_v2 = vadd.f32 %v393_v1, %v192_v61  ;;  %v395_v3 = vpop.f32.mrb[1].mxu1 }
 0x1f2   :  { %v396_v5 = vadd.f32 %v395_v3, %v196_v63  ;;  %v397_v6 = vpop.f32.mrb[2].mxu1 }
 0x1f3   :  { %v400_v8 = vmax.f32 %v394_v2, 0.0  ;;  %v398_v9 = vpop.f32.mrb[3].mxu1 }
 0x1f4   :  { %v401_v10 = vmax.f32 %v396_v5, 0.0 }
 0x1f5   :  { %v423_v11 = vmul.f32 %v418_v4, %v400_v8 }
 0x1f6   :  { %v424_v12 = vmul.f32 %v422_v7, %v401_v10 }
 0x1f8   :  { %v425_v13 = vadd.f32 %v424_v12, %v423_v11 }
 0x1fa   :  { %426 = vadd.xlane.f32.xlu0 %v425_v13 }
 0x287   :  { %v427_v15 = vpop.xlane.xlu0 %426 }
 0x288   :  { %v435_v16 = vadd.f32 %v481_v14, %v427_v15 }
 0x28a   :  { %437 = vst.msk [vmem:[%s722_s7] sm:$0xff] %vm436_vm1, %v435_v16 }
 0x28b   :  { %442 = vsyncpa [#allocation4], 1 }
 0x28c   :  { %443 = vsyncpa [#allocation6], 1 }

</bundles_post_ra>
